<compile_context>
chip_gen: v5e
topology: v5e:2x2
jax: 0.10.0
libtpu: 0.0.40
codegen_flags: <defaults>
</compile_context>

<pallas_src>
import functools

import jax
import jax.numpy as jnp
from jax import lax
from jax.experimental import pallas as pl
from jax.experimental.pallas import tpu as pltpu


def spectral_ffn_kernel(z_ref, w1t_ref, b1_ref, w2t_ref, b2_ref, o_ref, *,
                        chunk, num_chunks):
    # z_ref:  (tn, D)  untransposed batch-row tile (contiguous HBM read)
    # w1t_ref: (H, D), b1_ref: (H, 1), w2t_ref: (T, H), b2_ref: (T, 1)
    # o_ref:  (T, tn)  lane-dense output tile (batch on the 128-lane axis)
    w1t = w1t_ref[...]
    b1 = b1_ref[...]
    w2t = w2t_ref[...]
    b2 = b2_ref[...]

    @pl.loop(0, num_chunks)
    def _(j):
        c0 = pl.multiple_of(j * chunk, 128)

        zc = z_ref[pl.ds(c0, chunk), :]                       # (chunk, D)

        # Hidden layer: contract the feature axis of BOTH operands ("NT" matmul, same
        # form as q @ k^T) so the (H, chunk) result lands batch-on-lanes without any
        # wrapper transpose of Z.  MXU matmul, f32 accumulate.
        h = lax.dot_general(w1t, zc, (((1,), (1,)), ((), ())),
                            preferred_element_type=jnp.float32) + b1
        h = jnp.maximum(h, 0.0)                               # ReLU

        # Output layer: (T, H) @ (H, chunk) -> (T, chunk), lane-dense.
        y = jnp.dot(w2t, h, preferred_element_type=jnp.float32) + b2

        # Collapsed double softplus (see header): one exp + one log instead of two of each.
        y = jnp.where(y > 20.0, y, jnp.log(2.0 + jnp.exp(jnp.minimum(y, 20.0))))

        # Per-sample normalization: samples are lane columns, reduce over the tiny
        # sublane axis only (keeps padding columns fully independent).
        s = jnp.sum(y, axis=0, keepdims=True)                 # (1, chunk)
        inv = pl.reciprocal(s, approx=True)                   # EUP vrcp (free slot)
        inv = inv * (2.0 - s * inv)                           # one Newton step -> f32 accuracy
        o_ref[:, pl.ds(c0, chunk)] = (y * inv).astype(o_ref.dtype)


def spectral_ffn(Z, W1, b1, W2, b2, *, tn=4096, chunk=256,
                 vmem_budget_bytes=24 * 1024 * 1024):
    """Z: (N, D) f32; W1: (D, H); b1: (H,); W2: (H, T); b2: (T,) -> (N, T)."""
    N, D = Z.shape
    H = W1.shape[1]
    T = W2.shape[1]

    # ---- pick the outer lane tile -------------------------------------------
    # Streamed VMEM per batch column: Z row + output column, double-buffered by the
    # BlockSpec pipeline.  Resident weights (double-buffered, worst case) come off the top.
    weight_bytes = 2 * 4 * (H * D + H + T * H + T)
    bytes_per_col = 2 * 4 * (D + T)
    budget = max(vmem_budget_bytes - weight_bytes, 2 * 1024 * 1024)
    tn_cap = max(128, (budget // bytes_per_col) // 128 * 128)

    n_pad = pl.cdiv(N, 128) * 128                  # never tile wider than the padded batch
    tn = int(max(128, min(tn, tn_cap, n_pad)))
    tn = (tn // 128) * 128

    # v7x megacore: guarantee >= 2 grid steps when possible so the "parallel" axis can
    # shard across both TensorCores (harmless extra step on v5e/v6e).
    if pl.cdiv(N, tn) == 1 and n_pad > 128:
        tn = min(tn, pl.cdiv(pl.cdiv(N, 2), 128) * 128)

    # In-kernel chunking: tn must be a whole number of `chunk`-wide pieces.
    chunk = int(min(chunk, tn))
    chunk = max(128, (chunk // 128) * 128)
    tn = (tn // chunk) * chunk
    num_chunks = tn // chunk
    grid = (pl.cdiv(N, tn),)

    # Enforce / allow the VMEM budget (v5e scoped default is only 16 MiB; v7x physical 64 MiB).
    est_vmem = weight_bytes + tn * bytes_per_col + (1 << 20)
    vmem_limit = int(min(48 * 1024 * 1024, max(32 * 1024 * 1024, est_vmem)))

    # ---- resident weights in the kernel's (transposed) orientation ----------
    W1t = W1.T                   # (H, D) — tiny, resident across the whole grid
    W2t = W2.T                   # (T, H)
    b1c = b1.reshape(H, 1)
    b2c = b2.reshape(T, 1)

    cost = pl.CostEstimate(
        flops=2 * N * (D * H + H * T),
        transcendentals=3 * N * T,                 # exp + log (collapsed softplus) + recip
        bytes_accessed=4 * (N * D + D * H + H + H * T + T + N * T),
    )

    kernel = functools.partial(spectral_ffn_kernel, chunk=chunk, num_chunks=num_chunks)

    Yt = pl.pallas_call(
        kernel,
        out_shape=jax.ShapeDtypeStruct((T, N), jnp.float32),
        grid_spec=pltpu.PrefetchScalarGridSpec(
            num_scalar_prefetch=0,
            grid=grid,
            in_specs=[
                pl.BlockSpec((tn, D), lambda i: (i, 0)),     # Z row tile, untransposed
                pl.BlockSpec((H, D), lambda i: (0, 0)),      # W1^T (resident)
                pl.BlockSpec((H, 1), lambda i: (0, 0)),      # b1 column
                pl.BlockSpec((T, H), lambda i: (0, 0)),      # W2^T (resident)
                pl.BlockSpec((T, 1), lambda i: (0, 0)),      # b2 column
            ],
            out_specs=pl.BlockSpec((T, tn), lambda i: (0, i)),
        ),
        compiler_params=pltpu.CompilerParams(
            dimension_semantics=("parallel",),               # shards tiles across v7x's 2 TCs
            vmem_limit_bytes=vmem_limit,
        ),
        cost_estimate=cost,
    )(Z, W1t, b1c, W2t, b2c)

    return Yt.T                  # (N, T); T is tiny so this transpose is negligible


def _reference(Z, W1, b1, W2, b2):
    h = jnp.maximum(Z @ W1 + b1, 0.0)
    y = h @ W2 + b2
    y = jax.nn.softplus(y)
    y = jax.nn.softplus(y)       # literal chemprop double application
    return y / jnp.sum(y, axis=1, keepdims=True)


if __name__ == "__main__":
    # Small shapes consistent with the module: n x d input -> n x n_tasks output.
    N, D, H, T = 8, 32, 32, 4   # batch, input_dim, hidden_dim, n_tasks (n_targets=1)

    key = jax.random.PRNGKey(0)
    kz, kw1, kb1, kw2, kb2 = jax.random.split(key, 5)

    Z = jax.random.normal(kz, (N, D), dtype=jnp.float32)

    # Deterministic init mimicking torch.nn.Linear defaults (uniform +/- 1/sqrt(fan_in)).
    lim1 = 1.0 / (D ** 0.5)
    lim2 = 1.0 / (H ** 0.5)
    W1 = jax.random.uniform(kw1, (D, H), jnp.float32, -lim1, lim1)
    b1 = jax.random.uniform(kb1, (H,), jnp.float32, -lim1, lim1)
    W2 = jax.random.uniform(kw2, (H, T), jnp.float32, -lim2, lim2)
    b2 = jax.random.uniform(kb2, (T,), jnp.float32, -lim2, lim2)

    out = jax.block_until_ready(spectral_ffn(Z, W1, b1, W2, b2))
    ref = _reference(Z, W1, b1, W2, b2)
    assert out.shape == (N, T)
    assert bool(jnp.all(jnp.isfinite(out)))
    assert bool(jnp.allclose(jnp.sum(out, axis=1), 1.0, atol=1e-5))
    assert bool(jnp.allclose(out, ref, atol=1e-5, rtol=1e-5))

    # Ragged batch: exercises the >=2-step grid split and the partial last block.
    N2 = 300
    Z2 = jax.random.normal(jax.random.PRNGKey(1), (N2, D), dtype=jnp.float32)
    out2 = jax.block_until_ready(spectral_ffn(Z2, W1, b1, W2, b2))
    ref2 = _reference(Z2, W1, b1, W2, b2)
    assert out2.shape == (N2, T)
    assert bool(jnp.all(jnp.isfinite(out2)))
    assert bool(jnp.allclose(jnp.sum(out2, axis=1), 1.0, atol=1e-5))
    assert bool(jnp.allclose(out2, ref2, atol=1e-5, rtol=1e-5))

    # Multi-step grid + multi-chunk inner loop + partial last block.
    N3 = 1000
    Z3 = jax.random.normal(jax.random.PRNGKey(2), (N3, D), dtype=jnp.float32)
    out3 = jax.block_until_ready(spectral_ffn(Z3, W1, b1, W2, b2, tn=512, chunk=256))
    ref3 = _reference(Z3, W1, b1, W2, b2)
    assert out3.shape == (N3, T)
    assert bool(jnp.all(jnp.isfinite(out3)))
    assert bool(jnp.allclose(jnp.sum(out3, axis=1), 1.0, atol=1e-5))
    assert bool(jnp.allclose(out3, ref3, atol=1e-5, rtol=1e-5))

    print("KERNEL_OK")
</pallas_src>

<mosaic_0001>
module attributes {stable_mosaic.version = 11 : i64} {
  func.func @spectral_ffn_kernel(%arg0: i32, %arg1: memref<128x32xf32, #tpu.memory_space<vmem>>, %arg2: memref<32x32xf32, #tpu.memory_space<vmem>>, %arg3: memref<32x1xf32, #tpu.memory_space<vmem>>, %arg4: memref<4x32xf32, #tpu.memory_space<vmem>>, %arg5: memref<4x1xf32, #tpu.memory_space<vmem>>, %arg6: memref<4x128xf32, #tpu.memory_space<vmem>>) attributes {dimension_semantics = [#tpu.dimension_semantics<parallel>], iteration_bounds = array<i64: 1>, scalar_prefetch = 0 : i64, scratch_operands = 0 : i64, tpu.core_type = #tpu.core_type<tc>, window_params = [{transform_indices = @transform_0, window_bounds = array<i64: 128, 32>}, {pipeline_mode = #tpu.pipeline_mode<synchronous>, transform_indices = @transform_1, window_bounds = array<i64: 32, 32>}, {pipeline_mode = #tpu.pipeline_mode<synchronous>, transform_indices = @transform_2, window_bounds = array<i64: 32, 1>}, {pipeline_mode = #tpu.pipeline_mode<synchronous>, transform_indices = @transform_3, window_bounds = array<i64: 4, 32>}, {pipeline_mode = #tpu.pipeline_mode<synchronous>, transform_indices = @transform_4, window_bounds = array<i64: 4, 1>}, {transform_indices = @transform_5, window_bounds = array<i64: 4, 128>}]} {
    %c0 = arith.constant 0 : index
    %c0_0 = arith.constant 0 : index
    %0 = vector.load %arg2[%c0, %c0_0] : memref<32x32xf32, #tpu.memory_space<vmem>>, vector<32x32xf32>
    %c0_1 = arith.constant 0 : index
    %c0_2 = arith.constant 0 : index
    %1 = vector.load %arg3[%c0_1, %c0_2] : memref<32x1xf32, #tpu.memory_space<vmem>>, vector<32x1xf32>
    %c0_3 = arith.constant 0 : index
    %c0_4 = arith.constant 0 : index
    %2 = vector.load %arg4[%c0_3, %c0_4] : memref<4x32xf32, #tpu.memory_space<vmem>>, vector<4x32xf32>
    %c0_5 = arith.constant 0 : index
    %c0_6 = arith.constant 0 : index
    %3 = vector.load %arg5[%c0_5, %c0_6] : memref<4x1xf32, #tpu.memory_space<vmem>>, vector<4x1xf32>
    %c0_i32 = arith.constant 0 : i32
    %c1_i32 = arith.constant 1 : i32
    %4 = arith.muli %c0_i32, %c1_i32 : i32
    %c0_i32_7 = arith.constant 0 : i32
    %5 = arith.addi %c0_i32_7, %4 : i32
    %c128_i32 = arith.constant 128 : i32
    %6 = arith.muli %5, %c128_i32 : i32
    %7 = tpu.assume_multiple %6, 128 : i32
    %8 = arith.index_cast %7 : i32 to index
    %c0_8 = arith.constant 0 : index
    %9 = vector.load %arg1[%8, %c0_8] : memref<128x32xf32, #tpu.memory_space<vmem>>, vector<128x32xf32>
    %cst = arith.constant dense<0.000000e+00> : vector<32x128xf32>
    %10 = tpu.matmul %0, %9, %cst {dimension_numbers = #tpu.dot_dimension_numbers<[1], [1], [0], [0], [0, 0, 1, 0], [], []>} : vector<32x32xf32>, vector<128x32xf32>, vector<32x128xf32> -> vector<32x128xf32>
    %11 = vector.broadcast %1 : vector<32x1xf32> to vector<32x128xf32>
    %12 = arith.addf %10, %11 : vector<32x128xf32>
    %cst_9 = arith.constant 0.000000e+00 : f32
    %13 = vector.broadcast %cst_9 : f32 to vector<32x128xf32>
    %14 = arith.maximumf %12, %13 : vector<32x128xf32>
    %cst_10 = arith.constant dense<0.000000e+00> : vector<4x128xf32>
    %15 = tpu.matmul %2, %14, %cst_10 {dimension_numbers = #tpu.dot_dimension_numbers<[1], [0], [0], [1], [0, 0, 1, 1], [], []>} : vector<4x32xf32>, vector<32x128xf32>, vector<4x128xf32> -> vector<4x128xf32>
    %16 = vector.broadcast %3 : vector<4x1xf32> to vector<4x128xf32>
    %17 = arith.addf %15, %16 : vector<4x128xf32>
    %cst_11 = arith.constant 2.000000e+01 : f32
    %18 = vector.broadcast %cst_11 : f32 to vector<4x128xf32>
    %19 = arith.cmpf ogt, %17, %18 : vector<4x128xf32>
    %cst_12 = arith.constant 2.000000e+01 : f32
    %20 = vector.broadcast %cst_12 : f32 to vector<4x128xf32>
    %21 = arith.minimumf %17, %20 : vector<4x128xf32>
    %22 = math.exp %21 : vector<4x128xf32>
    %cst_13 = arith.constant 2.000000e+00 : f32
    %23 = vector.broadcast %cst_13 : f32 to vector<4x128xf32>
    %24 = arith.addf %23, %22 : vector<4x128xf32>
    %25 = math.log %24 : vector<4x128xf32>
    %26 = arith.select %19, %17, %25 : vector<4x128xi1>, vector<4x128xf32>
    %cst_14 = arith.constant dense<0.000000e+00> : vector<128xf32>
    %27 = vector.multi_reduction <add>, %26, %cst_14 [0] : vector<4x128xf32> to vector<128xf32>
    %28 = vector.shape_cast %27 : vector<128xf32> to vector<1x128xf32>
    %29 = tpu.reciprocal %28 {approx = true} : vector<1x128xf32> -> vector<1x128xf32>
    %30 = arith.mulf %28, %29 : vector<1x128xf32>
    %cst_15 = arith.constant 2.000000e+00 : f32
    %31 = vector.broadcast %cst_15 : f32 to vector<1x128xf32>
    %32 = arith.subf %31, %30 : vector<1x128xf32>
    %33 = arith.mulf %29, %32 : vector<1x128xf32>
    %34 = vector.broadcast %33 : vector<1x128xf32> to vector<4x128xf32>
    %35 = arith.mulf %26, %34 : vector<4x128xf32>
    %c0_16 = arith.constant 0 : index
    %36 = arith.index_cast %7 : i32 to index
    %37 = vector.load %arg6[%c0_16, %36] : memref<4x128xf32, #tpu.memory_space<vmem>>, vector<4x128xf32>
    tpu.vector_store %arg6[%c0_16, %36], %35 {strides = array<i32>} : memref<4x128xf32, #tpu.memory_space<vmem>>, vector<4x128xf32>,
    %c1_i32_17 = arith.constant 1 : i32
    return
  }
  func.func @transform_0(%arg0: i32) -> (i32, i32) {
    %c0_i32 = arith.constant 0 : i32
    %c0_i32_0 = arith.constant 0 : i32
    return %arg0, %c0_i32 : i32, i32
  }
  func.func @transform_1(%arg0: i32) -> (i32, i32) {
    %c0_i32 = arith.constant 0 : i32
    %c0_i32_0 = arith.constant 0 : i32
    %c0_i32_1 = arith.constant 0 : i32
    return %c0_i32, %c0_i32_0 : i32, i32
  }
  func.func @transform_2(%arg0: i32) -> (i32, i32) {
    %c0_i32 = arith.constant 0 : i32
    %c0_i32_0 = arith.constant 0 : i32
    %c0_i32_1 = arith.constant 0 : i32
    return %c0_i32, %c0_i32_0 : i32, i32
  }
  func.func @transform_3(%arg0: i32) -> (i32, i32) {
    %c0_i32 = arith.constant 0 : i32
    %c0_i32_0 = arith.constant 0 : i32
    %c0_i32_1 = arith.constant 0 : i32
    return %c0_i32, %c0_i32_0 : i32, i32
  }
  func.func @transform_4(%arg0: i32) -> (i32, i32) {
    %c0_i32 = arith.constant 0 : i32
    %c0_i32_0 = arith.constant 0 : i32
    %c0_i32_1 = arith.constant 0 : i32
    return %c0_i32, %c0_i32_0 : i32, i32
  }
  func.func @transform_5(%arg0: i32) -> (i32, i32) {
    %c0_i32 = arith.constant 0 : i32
    %c0_i32_0 = arith.constant 0 : i32
    return %c0_i32, %arg0 : i32, i32
  }
}

</mosaic_0001>

<bundles_post_ra>
// kernel: tpu_custom_call.1
= control target key start
LH: loop header
LB: loop body
LE: loop exit
PB: predicated region body
PF: predicated region fallthrough
CT: control target
= control target key end

     0   :  { %10 = vsyncpa [#allocation3], 0  ;;  %s487_s0 = inlined_call_operand.hbm [shape: f32[8,32], index: 0, kind: input, shape index: {}]   ;;  %s488_s1 = inlined_call_operand.vmem [shape: f32[32,32], index: 1, kind: input, shape index: {}]   ;;  %s489_s2 = inlined_call_operand.vmem [shape: f32[32,1], index: 2, kind: input, shape index: {}]   ;;  %s490_s3 = inlined_call_operand.vmem [shape: f32[4,32], index: 3, kind: input, shape index: {}]   ;;  %s491_s4 = inlined_call_operand.vmem [shape: f32[4,1], index: 4, kind: input, shape index: {}]   ;;  %s492_s5 = inlined_call_operand.hbm [shape: f32[4,8], index: 5, kind: output, shape index: {}]  }
   0x1   :  { %11 = vsyncpa [#allocation4], 0 }
   0x2   :  { %15 = vsyncadd [#allocation3], 1920  ;;  %s16_s20 = sshll.u32 %s487_s0, 4  ;;  %s363_s21 = smov [#allocation2]   ;;  %s17_s20 = int_to_ptr.hbm [resolvable:$true] %s16_s20 }
   0x3   :  { %s18_s22 = sshll.u32 %s363_s21, 4  ;;  %s364_s23 = smov 128   ;;  %s19_s22 = int_to_ptr.vmem [resolvable:$true] %s18_s22 }
   0x4   :  { %s365_s24 = smov 8  }
   0x5   :  { %24 = dma.hbm_to_vmem [thread:$0]  %s17_s20, 128, %s19_s22, [#allocation3], %s364_s23, %s364_s23, %s365_s24  }
   0x6   :  { %359 = dma.done.wait [#allocation3], 2048  }
   0x7   :  { %360 = vsyncadd [#allocation3], 4294965248  ;;  %vm83_vm0 = vcmask 261120   ;;  %v62_v0 = vld [vmem:[#allocation2 + $0x78] sm:$0xff]  ;;  %v61_v1 = vld [vmem:[#allocation2 + $0x70] sm:$0xff]  ;;  %v366_v10 = vmov 0  }
   0x8   :  { %266 = vmatpush.xpose.msk.msra.mxu3 %vm83_vm0, %v62_v0  ;;  %265 = vmatpush.xpose.msk.msra.mxu2 %vm83_vm0, %v62_v0  ;;  %v60_v2 = vld [vmem:[#allocation2 + $0x68] sm:$0xff]  ;;  %v59_v3 = vld [vmem:[#allocation2 + $0x60] sm:$0xff]  ;;  %v58_v4 = vld [vmem:[#allocation2 + $0x58] sm:$0xff]  ;;  %vm213_vm1 = vcmask 1043456   ;;  %s234_s19 = sshll.u32 %s492_s5, 4  ;;  %s235_s19 = int_to_ptr.hbm [resolvable:$true] %s234_s19 }
   0x9   :  { %244 = vmatpush.xpose.msk.msra.mxu0 %vm83_vm0, %v62_v0  ;;  %v57_v5 = vld [vmem:[#allocation2 + $0x50] sm:$0xff]  ;;  %v56_v6 = vld [vmem:[#allocation2 + $0x48] sm:$0xff]  ;;  %v55_v7 = vld [vmem:[#allocation2 + $0x40] sm:$0xff]  ;;  %302 = vset.pattern.permute.xlu0 %v366_v10 }
   0xa   :  { %v54_v8 = vld [vmem:[#allocation2 + $0x38] sm:$0xff]  ;;  %v53_v9 = vld [vmem:[#allocation2 + $0x30] sm:$0xff]  ;;  %303 = vset.pattern.permute.xlu1 %v366_v10  ;;  %304 = vset.pattern.permute.xlu2 %v366_v10  ;;  %v52_v11 = vld [vmem:[#allocation2 + $0x28] sm:$0xff] }
   0xb   :  { %v44_v12 = vld [vmem:[%s489_s2 + $0x18] sm:$0xff]  ;;  %v42_v13 = vld [vmem:[%s489_s2 + $0x8] sm:$0xff]  ;;  %v51_v14 = vld [vmem:[#allocation2 + $0x20] sm:$0xff] }
   0xc   :  { %268 = vmatpush.xpose.msk.msra.mxu3 %vm83_vm0, %v61_v1  ;;  %267 = vmatpush.xpose.msk.msra.mxu2 %vm83_vm0, %v61_v1  ;;  %v50_v15 = vld [vmem:[#allocation2 + $0x18] sm:$0xff]  ;;  %v43_v16 = vld [vmem:[%s489_s2 + $0x10] sm:$0xff]  ;;  %v41_v17 = vld [vmem:[%s489_s2] sm:$0xff] }
   0xd   :  { %245 = vmatpush.xpose.msk.msra.mxu0 %vm83_vm0, %v61_v1  ;;  %80 = vperm.xlu0 %302, %v44_v12   ;;  %v49_v18 = vld [vmem:[#allocation2 + $0x10] sm:$0xff]  ;;  %v48_v19 = vld [vmem:[#allocation2 + $0x8] sm:$0xff]  ;;  %v47_v20 = vld [vmem:[#allocation2] sm:$0xff] }
   0xe   :  { %70 = vperm.xlu1 %303, %v42_v13   ;;  %v39_v21 = vld [vmem:[%s488_s1 + $0x10] sm:$0xff]  ;;  %v38_v22 = vld [vmem:[%s488_s1 + $0x8] sm:$0xff]  ;;  %v37_v23 = vld [vmem:[%s488_s1] sm:$0xff] }
   0xf   :  { %v40_v24 = vld [vmem:[%s488_s1 + $0x18] sm:$0xff]  ;;  %v46_v25 = vld [vmem:[%s491_s4] sm:$0xf] }
  0x10   :  { %270 = vmatpush.xpose.msk.msra.mxu3 %vm83_vm0, %v60_v2  ;;  %269 = vmatpush.xpose.msk.msra.mxu2 %vm83_vm0, %v60_v2  ;;  %v45_v42 = vld [vmem:[%s490_s3] sm:$0xf]  ;;  %s367_s3 = smov [#allocation5]  }
  0x11   :  { %246 = vmatpush.xpose.msk.msra.mxu0 %vm83_vm0, %v60_v2  ;;  %179 = vperm.xlu2 %304, %v46_v25   ;;  %s232_s16 = sshll.u32 %s367_s3, 4  ;;  %s233_s16 = int_to_ptr.vmem [resolvable:$true] %s232_s16 }
  0x14   :  { %272 = vmatpush.xpose.msk.msra.mxu3 %vm83_vm0, %v59_v3  ;;  %271 = vmatpush.xpose.msk.msra.mxu2 %vm83_vm0, %v59_v3 }
  0x15   :  { %247 = vmatpush.xpose.msk.msra.mxu0 %vm83_vm0, %v59_v3  ;;  %75 = vperm.xlu0 %302, %v43_v16  }
  0x16   :  { %65 = vperm.xlu1 %303, %v41_v17  }
  0x18   :  { %274 = vmatpush.xpose.msk.msra.mxu3 %vm83_vm0, %v58_v4  ;;  %273 = vmatpush.xpose.msk.msra.mxu2 %vm83_vm0, %v58_v4 }
  0x19   :  { %248 = vmatpush.xpose.msk.msra.mxu0 %vm83_vm0, %v58_v4 }
  0x1c   :  { %276 = vmatpush.xpose.msk.msra.mxu3 %vm83_vm0, %v57_v5  ;;  %275 = vmatpush.xpose.msk.msra.mxu2 %vm83_vm0, %v57_v5 }
  0x1d   :  { %249 = vmatpush.xpose.msk.msra.mxu0 %vm83_vm0, %v57_v5 }
  0x20   :  { %278 = vmatpush.xpose.msk.msra.mxu3 %vm83_vm0, %v56_v6  ;;  %277 = vmatpush.xpose.msk.msra.mxu2 %vm83_vm0, %v56_v6 }
  0x21   :  { %250 = vmatpush.xpose.msk.msra.mxu0 %vm83_vm0, %v56_v6 }
  0x24   :  { %280 = vmatpush.xpose.msk.msra.mxu3 %vm83_vm0, %v55_v7  ;;  %279 = vmatpush.xpose.msk.msra.mxu2 %vm83_vm0, %v55_v7 }
  0x25   :  { %251 = vmatpush.xpose.msk.msra.mxu0 %vm83_vm0, %v55_v7 }
  0x28   :  { %282 = vmatpush.xpose.msk.msra.mxu3 %vm83_vm0, %v54_v8  ;;  %281 = vmatpush.xpose.msk.msra.mxu2 %vm83_vm0, %v54_v8 }
  0x29   :  { %252 = vmatpush.xpose.msk.msra.mxu0 %vm83_vm0, %v54_v8 }
  0x2c   :  { %284 = vmatpush.xpose.msk.msra.mxu3 %vm83_vm0, %v53_v9  ;;  %283 = vmatpush.xpose.msk.msra.mxu2 %vm83_vm0, %v53_v9 }
  0x2d   :  { %253 = vmatpush.xpose.msk.msra.mxu0 %vm83_vm0, %v53_v9 }
  0x30   :  { %286 = vmatpush.xpose.msk.msra.mxu3 %vm83_vm0, %v52_v11  ;;  %285 = vmatpush.xpose.msk.msra.mxu2 %vm83_vm0, %v52_v11 }
  0x31   :  { %254 = vmatpush.xpose.msk.msra.mxu0 %vm83_vm0, %v52_v11 }
  0x34   :  { %288 = vmatpush.xpose.msk.msra.mxu3 %vm83_vm0, %v51_v14  ;;  %287 = vmatpush.xpose.msk.msra.mxu2 %vm83_vm0, %v51_v14 }
  0x35   :  { %255 = vmatpush.xpose.msk.msra.mxu0 %vm83_vm0, %v51_v14 }
  0x38   :  { %290 = vmatpush.xpose.msk.msra.mxu3 %vm83_vm0, %v50_v15  ;;  %289 = vmatpush.xpose.msk.msra.mxu2 %vm83_vm0, %v50_v15 }
  0x39   :  { %256 = vmatpush.xpose.msk.msra.mxu0 %vm83_vm0, %v50_v15 }
  0x3c   :  { %292 = vmatpush.xpose.msk.msra.mxu3 %vm83_vm0, %v49_v18  ;;  %291 = vmatpush.xpose.msk.msra.mxu2 %vm83_vm0, %v49_v18 }
  0x3d   :  { %257 = vmatpush.xpose.msk.msra.mxu0 %vm83_vm0, %v49_v18 }
  0x40   :  { %294 = vmatpush.xpose.msk.msra.mxu3 %vm83_vm0, %v48_v19  ;;  %293 = vmatpush.xpose.msk.msra.mxu2 %vm83_vm0, %v48_v19 }
  0x41   :  { %258 = vmatpush.xpose.msk.msra.mxu0 %vm83_vm0, %v48_v19 }
  0x44   :  { %296 = vmatpush.xpose.msk.msra.mxu3 %vm83_vm0, %v47_v20  ;;  %295 = vmatpush.xpose.msk.msra.mxu2 %vm83_vm0, %v47_v20 }
  0x45   :  { %259 = vmatpush.xpose.msk.msra.mxu0 %vm83_vm0, %v47_v20 }
  0x47   :  { %262 = vmatmul.msk.f32.vlgmr.msra.gmra.mxu3 %vm83_vm0, %v39_v21  ;;  %261 = vmatmul.msk.f32.vlgmr.msra.gmra.mxu2 %vm83_vm0, %v38_v22 }
  0x48   :  { %260 = vmatmul.msk.f32.vlgmr.msra.gmra.mxu0 %vm83_vm0, %v37_v23 }
  0x4f   :  { %263 = vmatmul.msk.f32.gmra.mxu3 %vm83_vm0, %v40_v24 }
  0x6b   :  { %v180_v43 = vpop.permute.xlu2 %179 }
  0x7f   :  { %v81_v26 = vpop.permute.xlu0 %80 }
  0x80   :  { %v71_v27 = vpop.permute.xlu1 %70 }
  0x87   :  { %v76_v29 = vpop.permute.xlu0 %75 }
  0x88   :  { %v66_v34 = vpop.permute.xlu1 %65 }
  0xc5   :  { %v161_v35 = vpop.f32.mrf.mxu0 }
  0xc6   :  { %v162_v39 = vadd.f32 %v161_v35, %v66_v34 }
  0xc8   :  { %v173_v41 = vmax.f32 %v162_v39, 0.0 }
  0xca   :  { %v167_v28 = vpop.f32.mrf.mxu3  ;;  %v164_v30 = vpop.f32.mrf.mxu2 }
  0xcb   :  { %v168_v32 = vadd.f32 %v167_v28, %v76_v29  ;;  %v165_v36 = vadd.f32 %v164_v30, %v71_v27 }
  0xcd   :  { %v175_v38 = vmax.f32 %v168_v32, 0.0  ;;  %v174_v40 = vmax.f32 %v165_v36, 0.0 }
  0xd2   :  { %v170_v31 = vpop.f32.mrf.mxu3 }
  0xd3   :  { %v171_v33 = vadd.f32 %v170_v31, %v81_v26 }
  0xd5   :  { %v176_v37 = vmax.f32 %v171_v33, 0.0 }
  0xd7   :  { %197 = vmatpush.msra.mxu1 %v176_v37 }
  0xd9   :  { %198 = vmatpush.msra.mxu1 %v175_v38 }
  0xdb   :  { %199 = vmatpush.msra.mxu1 %v174_v40 }
  0xdd   :  { %200 = vmatpush.msra.mxu1 %v173_v41 }
  0xde   :  { %264 = vmatmul.msk.f32.vlgmr.msra.gmra.mxu1 %vm83_vm0, %v45_v42 }
 0x15b   :  { %v202_v44 = vpop.f32.mrf.mxu1 }
 0x15c   :  { %v203_v45 = vadd.f32 %v202_v44, %v180_v43 }
 0x15e   :  { %v206_v46 = vmin.f32 %v203_v45, 20.0  ;;  %vm205_vm2 = vcmp.gt.f32.partialorder %v203_v45, 20.0 }
 0x160   :  { %v207_v47 = vmul.f32 1.442695, %v206_v46 }
 0x162   :  { %305 = vpow2.f32 %v207_v47 }
 0x168   :  { %v306_v48 = vpop.eup %305 }
 0x169   :  { %v209_v49 = vadd.f32 2.0, %v306_v48 }
 0x16b   :  { %307 = vlog2.f32 %v209_v49 }
 0x171   :  { %v308_v50 = vpop.eup %307 }
 0x172   :  { %v211_v51 = vmul.f32 0.6931472, %v308_v50 }
 0x174   :  { %v212_v52 = vsel %vm205_vm2, %v203_v45, %v211_v51 }
 0x175   :  { %v214_v53 = vsel %vm213_vm1, %v212_v52, 0.0 }
 0x176   :  { %v215_v54 = vrot.slane %v214_v53, 4 }
 0x178   :  { %v216_v55 = vadd.f32 %v215_v54, %v214_v53 }
 0x17a   :  { %v217_v56 = vrot.slane %v216_v55, 2 }
 0x17c   :  { %v218_v57 = vadd.f32 %v217_v56, %v216_v55 }
 0x17e   :  { %v219_v58 = vrot.slane %v218_v57, 1 }
 0x180   :  { %v220_v59 = vadd.f32 %v219_v58, %v218_v57 }
 0x182   :  { %309 = vrcp.f32 %v220_v59 }
 0x188   :  { %v310_v60 = vpop.eup %309 }
 0x189   :  { %v222_v61 = vmul.f32 %v310_v60, %v220_v59 }
 0x18b   :  { %v223_v62 = vsub.f32 2.0, %v222_v61 }
 0x18d   :  { %v224_v63 = vmul.f32 %v310_v60, %v223_v62 }
 0x18f   :  { %v225_v0 = vmul.f32 %v224_v63, %v212_v52 }
 0x191   :  { %226 = vst [vmem:[#allocation5] sm:$0xf] %v225_v0 }
 0x192   :  { %237 = dma.vmem_to_hbm [thread:$0]  %s233_s16, 64, %s235_s19, [#allocation4]  }
 0x193   :  { %361 = dma.done.wait [#allocation4], 64  }
 0x194   :  { %362 = vsyncadd [#allocation4], 4294967232 }
 0x195   :  { %242 = vsyncpa [#allocation3], 1 }
 0x196   :  { %243 = vsyncpa [#allocation4], 1 }

</bundles_post_ra>
